<compile_context>
chip_gen: v5e
topology: v5e:2x2
jax: 0.10.0
libtpu: 0.0.40
codegen_flags: <defaults>
</compile_context>

<pallas_src>
import numpy as np
import jax
import jax.numpy as jnp
from jax.experimental import pallas as pl
from jax.experimental.pallas import tpu as pltpu


def _bezier_loss_kernel(data_ref, out_ref):
    # data_ref: (6, B, N, 4) f32 in VMEM
    #   plane 0/1 : predicted x / y   (element [b, n, k] == flat point 4*n + k)
    #   plane 2/3 : padded target x / y
    #   plane 4   : weight = valid-mask * 1/(B*max_target_len*2)  (torch .mean() divisor)
    #   plane 5   : per-point curve probability (curve prob repeated over its 4 points)
    px = data_ref[0]
    py = data_ref[1]
    tx = data_ref[2]
    ty = data_ref[3]
    w = data_ref[4]
    cp = data_ref[5]

    # x/y squared diffs folded together; weight already carries mask + mean divisor
    sq = (px - tx) ** 2 + (py - ty) ** 2          # (B, N, 4)
    point_loss = jnp.sum(sq * w * cp)             # == weighted_diffs.mean() in torch

    eps = 1e-10
    # mean over the 4x-repeated plane equals the mean over the raw (B, N) curve probs
    prob_reg = -jnp.mean(jnp.log(cp + eps) + jnp.log(1.0 - cp + eps))

    out_ref[0] = point_loss + 0.1 * prob_reg


@jax.jit
def _loss_on_device(pred_curve_points, pred_curve_prob, padded_targets, weight):
    b, n = pred_curve_prob.shape
    pred = pred_curve_points.astype(jnp.float32).reshape(b, n, 4, 2)
    px = pred[..., 0]                              # (B, N, 4)
    py = pred[..., 1]
    tgt = padded_targets.reshape(b, n, 4, 2)
    tx = tgt[..., 0]
    ty = tgt[..., 1]
    w = weight.reshape(b, n, 4)
    cp = jnp.broadcast_to(pred_curve_prob.astype(jnp.float32)[:, :, None], (b, n, 4))

    data = jnp.stack([px, py, tx, ty, w, cp], axis=0)   # (6, B, N, 4): one VMEM input

    out = pl.pallas_call(
        _bezier_loss_kernel,
        out_shape=jax.ShapeDtypeStruct((1,), jnp.float32),
        in_specs=[pl.BlockSpec(memory_space=pltpu.MemorySpace.VMEM)],
        out_specs=pl.BlockSpec(memory_space=pltpu.MemorySpace.SMEM),
    )(data)
    return out[0]


def bezier_vectorization_loss(pred_curve_points, pred_curve_prob, target_paths):
    """
    pred_curve_points: (B, N_curves, 8) f32  (4 control points * 2 coords per curve)
    pred_curve_prob:   (B, N_curves)    f32  in (0, 1)
    target_paths:      list of (L_i, 2) arrays (variable-length per batch element)
    """
    b, n_curves = pred_curve_prob.shape
    l_pad = 4 * n_curves          # static padded length == number of predicted points

    target_np = [np.asarray(t, np.float32) for t in target_paths]
    max_len = max(t.shape[0] for t in target_np)
    assert max_len <= l_pad, (
        "target path longer than the number of predicted points; the reference "
        "torch module cannot handle this case either")

    # torch .mean() is over (B, max_target_len, 2); fold its divisor into the mask
    # plane so the kernel (and its compilation) never depends on max_target_len.
    mean_scale = 1.0 / float(b * max_len * 2)
    padded = np.zeros((b, l_pad, 2), np.float32)
    weight = np.zeros((b, l_pad), np.float32)
    for i, t in enumerate(target_np):
        padded[i, : t.shape[0]] = t
        weight[i, : t.shape[0]] = mean_scale

    return _loss_on_device(
        jnp.asarray(pred_curve_points),
        jnp.asarray(pred_curve_prob),
        jnp.asarray(padded),
        jnp.asarray(weight),
    )


def _reference(pred_curve_points, pred_curve_prob, target_paths):
    # pure-JAX transcription of the torch forward, for verification
    b = pred_curve_points.shape[0]
    pred_points = jnp.asarray(pred_curve_points, jnp.float32).reshape(b, -1, 2)
    point_probs = jnp.repeat(jnp.asarray(pred_curve_prob, jnp.float32), 4, axis=1)[..., None]
    max_len = max(int(t.shape[0]) for t in target_paths)
    pred_points = pred_points[:, :max_len, :]
    point_probs = point_probs[:, :max_len, :]
    padded = jnp.zeros((b, max_len, 2), jnp.float32)
    masks = jnp.zeros((b, max_len, 1), jnp.float32)
    for i, t in enumerate(target_paths):
        t = jnp.asarray(t, jnp.float32)
        padded = padded.at[i, : t.shape[0]].set(t)
        masks = masks.at[i, : t.shape[0]].set(1.0)
    point_diffs = (pred_points - padded) ** 2
    weighted = point_diffs * point_probs * masks
    point_loss = weighted.mean()
    prob_reg = -jnp.mean(jnp.log(pred_curve_prob + 1e-10)
                         + jnp.log(1.0 - pred_curve_prob + 1e-10))
    return point_loss + 0.1 * prob_reg


if __name__ == "__main__":
    key = jax.random.PRNGKey(0)
    k1, k2, k3, k4 = jax.random.split(key, 4)

    B, N_CURVES = 2, 4  # 4 cubic-bezier curves -> 16 predicted points per batch element
    pred_curve_points = jax.random.normal(k1, (B, N_CURVES, 8), jnp.float32)
    pred_curve_prob = jax.nn.sigmoid(jax.random.normal(k2, (B, N_CURVES), jnp.float32))
    # variable-length targets (mirrors the torch list-of-tensors case)
    target_paths = [
        jax.random.normal(k3, (8, 2), jnp.float32),  # batch 0: 8 target points
        jax.random.normal(k4, (6, 2), jnp.float32),  # batch 1: 6 target points (padded)
    ]

    loss = bezier_vectorization_loss(pred_curve_points, pred_curve_prob, target_paths)
    jax.block_until_ready(loss)

    ref = _reference(pred_curve_points, pred_curve_prob, target_paths)
    assert jnp.allclose(loss, ref, rtol=1e-5, atol=1e-6), (float(loss), float(ref))
    print("KERNEL_OK")
</pallas_src>

<mosaic_0001>
module attributes {stable_mosaic.version = 11 : i64} {
  func.func @_bezier_loss_kernel(%arg0: memref<6x2x4x4xf32, #tpu.memory_space<vmem>>, %arg1: memref<1xf32, #tpu.memory_space<smem>>) attributes {dimension_semantics = [], scalar_prefetch = 0 : i64, scratch_operands = 0 : i64, tpu.core_type = #tpu.core_type<tc>} {
    %c0 = arith.constant 0 : index
    %c0_0 = arith.constant 0 : index
    %c0_1 = arith.constant 0 : index
    %c0_2 = arith.constant 0 : index
    %0 = vector.load %arg0[%c0, %c0_0, %c0_1, %c0_2] : memref<6x2x4x4xf32, #tpu.memory_space<vmem>>, vector<1x2x4x4xf32>
    %1 = vector.shape_cast %0 : vector<1x2x4x4xf32> to vector<2x4x4xf32>
    %c1 = arith.constant 1 : index
    %c0_3 = arith.constant 0 : index
    %c0_4 = arith.constant 0 : index
    %c0_5 = arith.constant 0 : index
    %2 = vector.load %arg0[%c1, %c0_3, %c0_4, %c0_5] : memref<6x2x4x4xf32, #tpu.memory_space<vmem>>, vector<1x2x4x4xf32>
    %3 = vector.shape_cast %2 : vector<1x2x4x4xf32> to vector<2x4x4xf32>
    %c2 = arith.constant 2 : index
    %c0_6 = arith.constant 0 : index
    %c0_7 = arith.constant 0 : index
    %c0_8 = arith.constant 0 : index
    %4 = vector.load %arg0[%c2, %c0_6, %c0_7, %c0_8] : memref<6x2x4x4xf32, #tpu.memory_space<vmem>>, vector<1x2x4x4xf32>
    %5 = vector.shape_cast %4 : vector<1x2x4x4xf32> to vector<2x4x4xf32>
    %c3 = arith.constant 3 : index
    %c0_9 = arith.constant 0 : index
    %c0_10 = arith.constant 0 : index
    %c0_11 = arith.constant 0 : index
    %6 = vector.load %arg0[%c3, %c0_9, %c0_10, %c0_11] : memref<6x2x4x4xf32, #tpu.memory_space<vmem>>, vector<1x2x4x4xf32>
    %7 = vector.shape_cast %6 : vector<1x2x4x4xf32> to vector<2x4x4xf32>
    %c4 = arith.constant 4 : index
    %c0_12 = arith.constant 0 : index
    %c0_13 = arith.constant 0 : index
    %c0_14 = arith.constant 0 : index
    %8 = vector.load %arg0[%c4, %c0_12, %c0_13, %c0_14] : memref<6x2x4x4xf32, #tpu.memory_space<vmem>>, vector<1x2x4x4xf32>
    %9 = vector.shape_cast %8 : vector<1x2x4x4xf32> to vector<2x4x4xf32>
    %c5 = arith.constant 5 : index
    %c0_15 = arith.constant 0 : index
    %c0_16 = arith.constant 0 : index
    %c0_17 = arith.constant 0 : index
    %10 = vector.load %arg0[%c5, %c0_15, %c0_16, %c0_17] : memref<6x2x4x4xf32, #tpu.memory_space<vmem>>, vector<1x2x4x4xf32>
    %11 = vector.shape_cast %10 : vector<1x2x4x4xf32> to vector<2x4x4xf32>
    %12 = arith.subf %1, %5 : vector<2x4x4xf32>
    %13 = arith.mulf %12, %12 : vector<2x4x4xf32>
    %14 = arith.subf %3, %7 : vector<2x4x4xf32>
    %15 = arith.mulf %14, %14 : vector<2x4x4xf32>
    %16 = arith.addf %13, %15 : vector<2x4x4xf32>
    %17 = arith.mulf %16, %9 : vector<2x4x4xf32>
    %18 = arith.mulf %17, %11 : vector<2x4x4xf32>
    %19 = vector.shape_cast %18 : vector<2x4x4xf32> to vector<1x2x4x4xf32>
    %cst = arith.constant dense<0.000000e+00> : vector<1xf32>
    %20 = vector.multi_reduction <add>, %19, %cst [1, 2, 3] : vector<1x2x4x4xf32> to vector<1xf32>
    %21 = vector.shape_cast %20 : vector<1xf32> to vector<1x1x1x1xf32>
    %22 = vector.extract %21[0, 0, 0, 0] : f32 from vector<1x1x1x1xf32>
    %cst_18 = arith.constant 1.000000e-10 : f32
    %23 = vector.broadcast %cst_18 : f32 to vector<2x4x4xf32>
    %24 = arith.addf %11, %23 : vector<2x4x4xf32>
    %25 = math.log %24 : vector<2x4x4xf32>
    %cst_19 = arith.constant 1.000000e+00 : f32
    %26 = vector.broadcast %cst_19 : f32 to vector<2x4x4xf32>
    %27 = arith.subf %26, %11 : vector<2x4x4xf32>
    %cst_20 = arith.constant 1.000000e-10 : f32
    %28 = vector.broadcast %cst_20 : f32 to vector<2x4x4xf32>
    %29 = arith.addf %27, %28 : vector<2x4x4xf32>
    %30 = math.log %29 : vector<2x4x4xf32>
    %31 = arith.addf %25, %30 : vector<2x4x4xf32>
    %32 = vector.shape_cast %31 : vector<2x4x4xf32> to vector<1x2x4x4xf32>
    %cst_21 = arith.constant dense<0.000000e+00> : vector<1xf32>
    %33 = vector.multi_reduction <add>, %32, %cst_21 [1, 2, 3] : vector<1x2x4x4xf32> to vector<1xf32>
    %34 = vector.shape_cast %33 : vector<1xf32> to vector<1x1x1x1xf32>
    %35 = vector.extract %34[0, 0, 0, 0] : f32 from vector<1x1x1x1xf32>
    %cst_22 = arith.constant 3.200000e+01 : f32
    %36 = arith.divf %35, %cst_22 : f32
    %cst_23 = arith.constant 0.000000e+00 : f32
    %37 = arith.subf %cst_23, %36 : f32
    %cst_24 = arith.constant 1.000000e-01 : f32
    %38 = arith.mulf %cst_24, %37 : f32
    %39 = arith.addf %22, %38 : f32
    %c0_25 = arith.constant 0 : index
    %40 = memref.load %arg1[%c0_25] : memref<1xf32, #tpu.memory_space<smem>>
    memref.store %39, %arg1[%c0_25] : memref<1xf32, #tpu.memory_space<smem>>
    return
  }
}

</mosaic_0001>

<bundles_post_ra>
// kernel: _loss_on_device.1
= control target key start
LH: loop header
LB: loop body
LE: loop exit
PB: predicated region body
PF: predicated region fallthrough
CT: control target
= control target key end

     0   :  { %s207_s0 = inlined_call_operand.vmem [shape: f32[6,2,4,4], index: 0, kind: input, shape index: {}]   ;;  %s208_s1 = inlined_call_operand.hbm [shape: f32[1], index: 1, kind: output, shape index: {}]  }
   0x1   :  { %v9_v0 = vld [vmem:[%s207_s0] sm:$0xf]  ;;  %v10_v1 = vld [vmem:[%s207_s0 + $0x4] sm:$0xf]  ;;  %v110_v2 = vld [vmem:[%s207_s0 + $0x8] sm:$0xf] }
   0x2   :  { %v111_v3 = vld [vmem:[%s207_s0 + $0xc] sm:$0xf]  ;;  %v112_v4 = vld [vmem:[%s207_s0 + $0x10] sm:$0xf]  ;;  %v113_v5 = vld [vmem:[%s207_s0 + $0x14] sm:$0xf] }
   0x3   :  { %v114_v6 = vld [vmem:[%s207_s0 + $0x18] sm:$0xf]  ;;  %v115_v7 = vld [vmem:[%s207_s0 + $0x1c] sm:$0xf]  ;;  %v26_v8 = vsub.f32 %v9_v0, %v112_v4  ;;  %v27_v9 = vsub.f32 %v10_v1, %v113_v5  ;;  %v118_v10 = vld [vmem:[%s207_s0 + $0x28] sm:$0xf] }
   0x4   :  { %v119_v11 = vld [vmem:[%s207_s0 + $0x2c] sm:$0xf]  ;;  %v30_v12 = vsub.f32 %v110_v2, %v114_v6  ;;  %v31_v13 = vsub.f32 %v111_v3, %v115_v7  ;;  %v53_v16 = vadd.f32 1e-10, %v118_v10 }
   0x5   :  { %v28_v14 = vmul.f32 %v26_v8, %v26_v8  ;;  %v29_v15 = vmul.f32 %v27_v9, %v27_v9 }
   0x6   :  { %6 = vsyncpa [#allocation3], 0  ;;  %v32_v17 = vmul.f32 %v30_v12, %v30_v12  ;;  %v33_v18 = vmul.f32 %v31_v13, %v31_v13  ;;  %v54_v19 = vadd.f32 1e-10, %v119_v11  ;;  %v59_v20 = vsub.f32 1.0, %v118_v10  ;;  %s100_s7 = sshll.u32 %s208_s1, 4  ;;  %s101_s7 = int_to_ptr.hbm [resolvable:$true] %s100_s7 }
   0x7   :  { %v116_v21 = vld [vmem:[%s207_s0 + $0x20] sm:$0xf]  ;;  %v117_v22 = vld [vmem:[%s207_s0 + $0x24] sm:$0xf]  ;;  %128 = vlog2.f32 %v53_v16  ;;  %v60_v23 = vsub.f32 1.0, %v119_v11  ;;  %vm40_vm0 = vcmask 27648  }
   0x8   :  { %v34_v24 = vadd.f32 %v32_v17, %v28_v14  ;;  %v35_v25 = vadd.f32 %v33_v18, %v29_v15  ;;  %130 = vlog2.f32 %v54_v19  ;;  %v61_v26 = vadd.f32 1e-10, %v59_v20  ;;  %s153_s10 = smov [#allocation2]  }
   0x9   :  { %v62_v27 = vadd.f32 1e-10, %v60_v23  ;;  %v152_v48 = vmov 32.0  }
   0xa   :  { %v36_v28 = vmul.f32 %v116_v21, %v34_v24  ;;  %v37_v29 = vmul.f32 %v117_v22, %v35_v25  ;;  %132 = vlog2.f32 %v61_v26 }
   0xb   :  { %134 = vlog2.f32 %v62_v27 }
   0xc   :  { %v38_v30 = vmul.f32 %v118_v10, %v36_v28  ;;  %v39_v31 = vmul.f32 %v119_v11, %v37_v29  ;;  %136 = vrcp.f32 %v152_v48 }
   0xd   :  { %v129_v32 = vpop.eup %128 }
   0xe   :  { %v131_v33 = vpop.eup %130  ;;  %v41_v34 = vsel %vm40_vm0, %v38_v30, 0.0  ;;  %v42_v35 = vsel %vm40_vm0, %v39_v31, 0.0  ;;  %v56_v37 = vmul.f32 0.6931472, %v129_v32 }
   0xf   :  { %v43_v36 = vadd.f32 %v42_v35, %v41_v34  ;;  %v58_v39 = vmul.f32 0.6931472, %v131_v33 }
  0x10   :  { %v133_v38 = vpop.eup %132 }
  0x11   :  { %v135_v40 = vpop.eup %134  ;;  %44 = vadd.xlane.f32.xlu0 %v43_v36  ;;  %v64_v41 = vmul.f32 0.6931472, %v133_v38 }
  0x12   :  { %v66_v42 = vmul.f32 0.6931472, %v135_v40  ;;  %v137_v49 = vpop.eup %136 }
  0x13   :  { %v67_v43 = vadd.f32 %v64_v41, %v56_v37  ;;  %v82_v53 = vmul.f32 32.0, %v137_v49  ;;  %vm86_vm1 = vweird.f32 %v137_v49 }
  0x14   :  { %v68_v44 = vadd.f32 %v66_v42, %v58_v39 }
  0x15   :  { %v69_v45 = vsel %vm40_vm0, %v67_v43, 0.0  ;;  %v83_v56 = vsub.f32 1.0, %v82_v53 }
  0x16   :  { %v70_v46 = vsel %vm40_vm0, %v68_v44, 0.0 }
  0x17   :  { %v71_v47 = vadd.f32 %v70_v46, %v69_v45  ;;  %v84_v62 = vmul.f32 %v137_v49, %v83_v56 }
  0x19   :  { %72 = vadd.xlane.f32.xlu0 %v71_v47  ;;  %v85_v1 = vadd.f32 %v137_v49, %v84_v62 }
  0x1b   :  { %v87_v4 = vsel %vm86_vm1, %v137_v49, %v85_v1 }
  0x84   :  { %v45_v50 = vpop.xlane.xlu0 %44 }
  0x85   :  { %v46_v51 = vrot.slane %v45_v50, 4 }
  0x87   :  { %v47_v52 = vadd.f32 %v46_v51, %v45_v50 }
  0x89   :  { %v48_v54 = vrot.slane %v47_v52, 2 }
  0x8b   :  { %v49_v55 = vadd.f32 %v48_v54, %v47_v52 }
  0x8c   :  { %v73_v57 = vpop.xlane.xlu0 %72 }
  0x8d   :  { %v74_v58 = vrot.slane %v73_v57, 4  ;;  %v50_v59 = vrot.slane %v49_v55, 1 }
  0x8f   :  { %v75_v60 = vadd.f32 %v74_v58, %v73_v57  ;;  %v51_v61 = vadd.f32 %v50_v59, %v49_v55 }
  0x91   :  { %v76_v63 = vrot.slane %v75_v60, 2  ;;  %120 = vpush %v51_v61 }
  0x93   :  { %v77_v0 = vadd.f32 %v76_v63, %v75_v60 }
  0x95   :  { %v78_v2 = vrot.slane %v77_v0, 1 }
  0x97   :  { %v79_v3 = vadd.f32 %v78_v2, %v77_v0 }
  0x99   :  { %122 = vpush %v79_v3 }
  0x9a   :  { %124 = vpush %v87_v4 }
  0xc2   :  { %s121_s0 = spop %120 }
  0xca   :  { %s123_s30 = spop %122 }
  0xcb   :  { %s125_s2 = spop %124 }
  0xcc   :  { %s89_s3 = smul.f32 %s125_s2, %s123_s30 }
  0xce   :  { %s90_s4 = ssub.f32 0.0, %s89_s3 }
  0xd0   :  { %s91_s8 = smul.f32 0.1, %s90_s4 }
  0xd2   :  { %s92_s9 = sadd.f32 %s121_s0, %s91_s8 }
  0xd4   :  { %94 = sst [smem:[#allocation2]] %s92_s9 }
  0xd5   :  { %103 = dma.smem_to_hbm %s153_s10, 16, %s101_s7, [#allocation3]  }
  0xd6   :  { %150 = dma.done.wait [#allocation3], 16  }
  0xd7   :  { %151 = vsyncadd [#allocation3], 4294967280 }
  0xd8   :  { %108 = sfence }
  0xd9   :  { %109 = vsyncpa [#allocation3], 1 }

</bundles_post_ra>
